<compile_context>
chip_gen: v5e
topology: v5e:2x2
jax: 0.10.0
libtpu: 0.0.40
codegen_flags: <defaults>
</compile_context>

<pallas_src>
import jax
import jax.numpy as jnp
from jax import lax
from jax.experimental import pallas as pl
from jax.experimental.pallas import tpu as pltpu

EPS = 1e-5


def _round_up(x, m):
    return ((x + m - 1) // m) * m


def _tpu_vmem_bytes():
    try:
        info = pltpu.get_tpu_info()
        return int(getattr(info, "vmem_capacity_bytes", 64 * 1024 * 1024))
    except Exception:
        return 64 * 1024 * 1024          # conservative default (v7x physical VMEM)


def _plan(p, cin, cout1, cout2):
    """Generation-aware pixel-tile / VMEM-limit selection."""
    vmem_cap = _tpu_vmem_bytes()
    vmem_limit = min(vmem_cap * 3 // 4, 96 * 1024 * 1024)     # ~48 MiB on v7x, ~96 MiB v5e/v6e
    stream_budget = vmem_limit // 3                           # double-buffered streaming blocks
    chans = max(cin + 1 + cout1, cout1 + cout2)               # fp32 words streamed per pixel col
    tile = (stream_budget // (2 * chans * 4)) // 128 * 128
    tile = max(128, min(8192, tile))
    tile = min(tile, _round_up(p, 128))                       # don't over-pad tiny problems
    num_tiles = -(-p // tile)
    n_outer = 2 if num_tiles >= 2 else 1                      # v7x: both TCs get partials
    n_inner = -(-num_tiles // n_outer)
    p_pad = n_outer * n_inner * tile
    return tile, n_outer, n_inner, p_pad, vmem_limit


# --------------------------------- kernels ---------------------------------

def _gram_kernel(x_ref, g_ref, s_ref):
    """Accumulate sum_p x x^T (C,C) and sum_p x (C,1) over the inner grid axis."""
    x = x_ref[...]
    g = lax.dot_general(x, x, (((1,), (1,)), ((), ())),
                        preferred_element_type=jnp.float32)
    s = jnp.sum(x, axis=1, keepdims=True)

    @pl.when(pl.program_id(1) == 0)
    def _():
        g_ref[...] = jnp.zeros_like(g_ref)
        s_ref[...] = jnp.zeros_like(s_ref)

    g_ref[...] += g[None, :, :]
    s_ref[...] += s[None, :, :]


def _conv_relu_gram_kernel(x_ref, m_ref, w_ref, b_ref, h_ref, g_ref, s_ref):
    """h = mask * ReLU(W_eff x + b_eff) written in the padded pixel layout, plus the
    running Gram / sums of h needed for the *next* stage's BatchNorm (fused pass A)."""
    y = jnp.dot(w_ref[...], x_ref[...], preferred_element_type=jnp.float32)
    h = jnp.maximum(y + b_ref[...], 0.0) * m_ref[...]
    h_ref[...] = h

    g = lax.dot_general(h, h, (((1,), (1,)), ((), ())),
                        preferred_element_type=jnp.float32)
    s = jnp.sum(h, axis=1, keepdims=True)

    @pl.when(pl.program_id(1) == 0)
    def _():
        g_ref[...] = jnp.zeros_like(g_ref)
        s_ref[...] = jnp.zeros_like(s_ref)

    g_ref[...] += g[None, :, :]
    s_ref[...] += s[None, :, :]


def _conv_relu_kernel(x_ref, w_ref, b_ref, o_ref):
    """o = ReLU(W_eff x + b_eff); lane-dense (Cout, TILE) output blocks."""
    y = jnp.dot(w_ref[...], x_ref[...], preferred_element_type=jnp.float32)
    o_ref[...] = jnp.maximum(y + b_ref[...], 0.0)


# --------------------------------- wrapper ---------------------------------

def _fold_bn(g_mat, s_vec, n_total, w, b, gamma, beta):
    """Fold conv bias + training-mode BatchNorm (biased var, eps=1e-5) into W_eff, b_eff.

    g_mat = sum_p x x^T and s_vec = sum_p x over the padded-pixel population of size n_total
    (zero-pad pixels contribute nothing to the sums but are counted in n_total)."""
    mu = s_vec / n_total
    cov = g_mat / n_total - jnp.outer(mu, mu)
    mean_y = w @ mu + b
    var_y = jnp.sum((w @ cov) * w, axis=1)           # biased variance; bias cancels exactly
    scale = gamma * lax.rsqrt(var_y + EPS)
    return scale[:, None] * w, scale * (b - mean_y) + beta


def unet_block(x_nchw, params):
    """Full UNetBlock forward. Input/output are NCHW like the PyTorch module."""
    n, cin, h, w = x_nchw.shape
    cout1 = params["w1"].shape[0]
    cout2 = params["w2"].shape[0]
    hp1, wp1 = h + 2, w + 2            # stage-1 conv output extent (k=1, padding=1)
    hp2, wp2 = h + 4, w + 4            # stage-2 conv output extent == final output
    p = n * hp2 * wp2                  # every activation lives in this padded pixel layout

    tile, n_outer, n_inner, p_pad, vmem_limit = _plan(p, cin, cout1, cout2)
    n_tiles = n_outer * n_inner

    f32 = jnp.float32
    wt1 = params["w1"].astype(f32); bs1 = params["b1"].astype(f32)
    gm1 = params["g1"].astype(f32); bt1 = params["beta1"].astype(f32)
    wt2 = params["w2"].astype(f32); bs2 = params["b2"].astype(f32)
    gm2 = params["g2"].astype(f32); bt2 = params["beta2"].astype(f32)

    # Channel-major input, zero-padded straight into the final (H+4, W+4) pixel layout
    # (single entry-time layout change; no per-stage pads or output re-assembly later).
    x_c = jnp.transpose(x_nchw, (1, 0, 2, 3)).astype(f32)               # (Cin, N, H, W)
    x_full = jnp.pad(x_c, ((0, 0), (0, 0), (2, 2), (2, 2))).reshape(cin, p)
    if p_pad == p:
        x_cp = x_full
    else:
        x_cp = jnp.zeros((cin, p_pad), f32).at[:, :p].set(x_full)

    # Per-pixel mask of the (H+2, W+2) window: 1 where the stage-1 output exists, 0 on the
    # outermost ring (= stage 2's zero padding) and on the dummy tail columns.
    m2d = jnp.zeros((hp2, wp2), f32).at[1:hp2 - 1, 1:wp2 - 1].set(1.0)
    mask = jnp.zeros((1, p_pad), f32).at[0, :p].set(jnp.tile(m2d.reshape(-1), n))

    comp_acc = pltpu.CompilerParams(
        dimension_semantics=("parallel", "arbitrary"),
        vmem_limit_bytes=vmem_limit)

    pix_map = lambda o, i: (0, o * n_inner + i)
    acc_map = lambda o, i: (o, 0, 0)
    const_map = lambda o, i: (0, 0)

    # --- call 1: W-independent input statistics (Gram + per-channel sums) ---
    g1_part, s1_part = pl.pallas_call(
        _gram_kernel,
        out_shape=(jax.ShapeDtypeStruct((n_outer, cin, cin), f32),
                   jax.ShapeDtypeStruct((n_outer, cin, 1), f32)),
        grid=(n_outer, n_inner),
        in_specs=[pl.BlockSpec((cin, tile), pix_map)],
        out_specs=(pl.BlockSpec((1, cin, cin), acc_map),
                   pl.BlockSpec((1, cin, 1), acc_map)),
        compiler_params=comp_acc,
        cost_estimate=pl.CostEstimate(
            flops=int(2 * cin * cin * p_pad + cin * p_pad), transcendentals=0,
            bytes_accessed=int(4 * (cin * p_pad + n_outer * cin * (cin + 1)))),
    )(x_cp)
    g1s = jnp.sum(g1_part, axis=0)
    s1s = jnp.sum(s1_part, axis=0)[:, 0]
    w1_eff, b1_eff = _fold_bn(g1s, s1s, float(n * hp1 * wp1), wt1, bs1, gm1, bt1)

    # --- call 2: stage-1 conv+BN+ReLU -> padded h1, fused with stage-2 statistics ---
    h1_cp, g2_part, s2_part = pl.pallas_call(
        _conv_relu_gram_kernel,
        out_shape=(jax.ShapeDtypeStruct((cout1, p_pad), f32),
                   jax.ShapeDtypeStruct((n_outer, cout1, cout1), f32),
                   jax.ShapeDtypeStruct((n_outer, cout1, 1), f32)),
        grid=(n_outer, n_inner),
        in_specs=[pl.BlockSpec((cin, tile), pix_map),
                  pl.BlockSpec((1, tile), pix_map),
                  pl.BlockSpec((cout1, cin), const_map),
                  pl.BlockSpec((cout1, 1), const_map)],
        out_specs=(pl.BlockSpec((cout1, tile), pix_map),
                   pl.BlockSpec((1, cout1, cout1), acc_map),
                   pl.BlockSpec((1, cout1, 1), acc_map)),
        compiler_params=comp_acc,
        cost_estimate=pl.CostEstimate(
            flops=int((2 * cin + 2 * cout1 + 3) * cout1 * p_pad), transcendentals=0,
            bytes_accessed=int(4 * ((cin + 1 + cout1) * p_pad + cin * cout1 + cout1
                                    + n_outer * cout1 * (cout1 + 1)))),
    )(x_cp, mask, w1_eff, b1_eff[:, None])
    g2s = jnp.sum(g2_part, axis=0)
    s2s = jnp.sum(s2_part, axis=0)[:, 0]
    w2_eff, b2_eff = _fold_bn(g2s, s2s, float(p), wt2, bs2, gm2, bt2)

    # --- call 3: stage-2 conv+BN+ReLU, written directly in the final padded layout ---
    out_cp = pl.pallas_call(
        _conv_relu_kernel,
        out_shape=jax.ShapeDtypeStruct((cout2, p_pad), f32),
        grid=(n_tiles,),
        in_specs=[pl.BlockSpec((cout1, tile), lambda i: (0, i)),
                  pl.BlockSpec((cout2, cout1), lambda i: (0, 0)),
                  pl.BlockSpec((cout2, 1), lambda i: (0, 0))],
        out_specs=pl.BlockSpec((cout2, tile), lambda i: (0, i)),
        compiler_params=pltpu.CompilerParams(
            dimension_semantics=("parallel",),
            vmem_limit_bytes=vmem_limit),
        cost_estimate=pl.CostEstimate(
            flops=int(2 * (cout1 + 1) * cout2 * p_pad), transcendentals=0,
            bytes_accessed=int(4 * ((cout1 + cout2) * p_pad + cout1 * cout2 + cout2))),
    )(h1_cp, w2_eff, b2_eff[:, None])

    out = out_cp[:, :p].reshape(cout2, n, hp2, wp2)
    return jnp.transpose(out, (1, 0, 2, 3))                   # channel-major -> NCHW


# ----------------------- pure-JAX reference for verification -----------------------
def _ref_stage(x_nchw, w, b, gamma, beta):
    xp = jnp.pad(x_nchw, ((0, 0), (0, 0), (1, 1), (1, 1)))
    y = jnp.einsum("nchw,oc->nohw", xp, w) + b[None, :, None, None]
    mean = jnp.mean(y, axis=(0, 2, 3), keepdims=True)
    var = jnp.mean(jnp.square(y - mean), axis=(0, 2, 3), keepdims=True)
    yn = (y - mean) * lax.rsqrt(var + EPS)
    yn = yn * gamma[None, :, None, None] + beta[None, :, None, None]
    return jnp.maximum(yn, 0.0)


def unet_block_ref(x_nchw, params):
    x = _ref_stage(x_nchw, params["w1"], params["b1"], params["g1"], params["beta1"])
    x = _ref_stage(x, params["w2"], params["b2"], params["g2"], params["beta2"])
    return x


if __name__ == "__main__":
    # Small shapes consistent with the module: N=2, in_channels=4, out_channels=8, 16x16
    N, C_IN, C_OUT, H, W = 2, 4, 8, 16, 16

    key = jax.random.PRNGKey(0)
    k_x, k_w1, k_b1, k_w2, k_b2, k_g1, k_bt1, k_g2, k_bt2 = jax.random.split(key, 9)

    x = jax.random.normal(k_x, (N, C_IN, H, W), dtype=jnp.float32)

    # Conv weights stored as (Cout, Cin) == PyTorch (Cout, Cin, 1, 1) squeezed.
    params = {
        "w1": 0.1 * jax.random.normal(k_w1, (C_OUT, C_IN), dtype=jnp.float32),
        "b1": 0.1 * jax.random.normal(k_b1, (C_OUT,), dtype=jnp.float32),
        "g1": 1.0 + 0.1 * jax.random.normal(k_g1, (C_OUT,), dtype=jnp.float32),
        "beta1": 0.1 * jax.random.normal(k_bt1, (C_OUT,), dtype=jnp.float32),
        "w2": 0.1 * jax.random.normal(k_w2, (C_OUT, C_OUT), dtype=jnp.float32),
        "b2": 0.1 * jax.random.normal(k_b2, (C_OUT,), dtype=jnp.float32),
        "g2": 1.0 + 0.1 * jax.random.normal(k_g2, (C_OUT,), dtype=jnp.float32),
        "beta2": 0.1 * jax.random.normal(k_bt2, (C_OUT,), dtype=jnp.float32),
    }

    fwd = jax.jit(unet_block)
    out = jax.block_until_ready(fwd(x, params))
    ref = jax.block_until_ready(unet_block_ref(x, params))

    assert out.shape == (N, C_OUT, H + 4, W + 4), out.shape
    max_err = float(jnp.max(jnp.abs(out - ref)))
    assert max_err < 5e-4, max_err
    print("KERNEL_OK")
</pallas_src>

<mosaic_0001>
module attributes {stable_mosaic.version = 11 : i64} {
  func.func @_gram_kernel(%arg0: i32, %arg1: i32, %arg2: memref<4x896xf32, #tpu.memory_space<vmem>>, %arg3: memref<1x4x4xf32, #tpu.memory_space<vmem>>, %arg4: memref<1x4x1xf32, #tpu.memory_space<vmem>>) attributes {dimension_semantics = [#tpu.dimension_semantics<parallel>, #tpu.dimension_semantics<arbitrary>], iteration_bounds = array<i64: 1, 1>, scalar_prefetch = 0 : i64, scratch_operands = 0 : i64, tpu.core_type = #tpu.core_type<tc>, window_params = [{transform_indices = @transform_0, window_bounds = array<i64: 4, 896>}, {transform_indices = @transform_1, window_bounds = array<i64: 1, 4, 4>}, {transform_indices = @transform_2, window_bounds = array<i64: 1, 4, 1>}]} {
    %c0 = arith.constant 0 : index
    %c0_0 = arith.constant 0 : index
    %0 = vector.load %arg2[%c0, %c0_0] : memref<4x896xf32, #tpu.memory_space<vmem>>, vector<4x896xf32>
    %cst = arith.constant dense<0.000000e+00> : vector<4x4xf32>
    %1 = tpu.matmul %0, %0, %cst {dimension_numbers = #tpu.dot_dimension_numbers<[1], [1], [0], [0], [0, 0, 1, 0], [], []>} : vector<4x896xf32>, vector<4x896xf32>, vector<4x4xf32> -> vector<4x4xf32>
    %cst_1 = arith.constant dense<0.000000e+00> : vector<4xf32>
    %2 = vector.multi_reduction <add>, %0, %cst_1 [1] : vector<4x896xf32> to vector<4xf32>
    %3 = vector.shape_cast %2 : vector<4xf32> to vector<4x1xf32>
    %c0_i32 = arith.constant 0 : i32
    %4 = arith.cmpi eq, %arg1, %c0_i32 : i32
    %5 = arith.extui %4 : i1 to i32
    %c0_i32_2 = arith.constant 0 : i32
    %6 = arith.cmpi ne, %5, %c0_i32_2 : i32
    scf.if %6 {
      %cst_15 = arith.constant 0.000000e+00 : f32
      %15 = vector.broadcast %cst_15 : f32 to vector<1x4x4xf32>
      %c0_16 = arith.constant 0 : index
      %c0_17 = arith.constant 0 : index
      %c0_18 = arith.constant 0 : index
      %16 = vector.load %arg3[%c0_16, %c0_17, %c0_18] : memref<1x4x4xf32, #tpu.memory_space<vmem>>, vector<1x4x4xf32>
      tpu.vector_store %arg3[%c0_16, %c0_17, %c0_18], %15 {strides = array<i32>} : memref<1x4x4xf32, #tpu.memory_space<vmem>>, vector<1x4x4xf32>,
      %cst_19 = arith.constant 0.000000e+00 : f32
      %17 = vector.broadcast %cst_19 : f32 to vector<1x4x1xf32>
      %c0_20 = arith.constant 0 : index
      %c0_21 = arith.constant 0 : index
      %c0_22 = arith.constant 0 : index
      %18 = vector.load %arg4[%c0_20, %c0_21, %c0_22] : memref<1x4x1xf32, #tpu.memory_space<vmem>>, vector<1x4x1xf32>
      tpu.vector_store %arg4[%c0_20, %c0_21, %c0_22], %17 {strides = array<i32>} : memref<1x4x1xf32, #tpu.memory_space<vmem>>, vector<1x4x1xf32>,
    } else {
    }
    %c0_3 = arith.constant 0 : index
    %c0_4 = arith.constant 0 : index
    %c0_5 = arith.constant 0 : index
    %7 = vector.load %arg3[%c0_3, %c0_4, %c0_5] : memref<1x4x4xf32, #tpu.memory_space<vmem>>, vector<1x4x4xf32>
    %8 = vector.shape_cast %1 : vector<4x4xf32> to vector<1x4x4xf32>
    %9 = arith.addf %7, %8 : vector<1x4x4xf32>
    %c0_6 = arith.constant 0 : index
    %c0_7 = arith.constant 0 : index
    %c0_8 = arith.constant 0 : index
    %10 = vector.load %arg3[%c0_6, %c0_7, %c0_8] : memref<1x4x4xf32, #tpu.memory_space<vmem>>, vector<1x4x4xf32>
    tpu.vector_store %arg3[%c0_6, %c0_7, %c0_8], %9 {strides = array<i32>} : memref<1x4x4xf32, #tpu.memory_space<vmem>>, vector<1x4x4xf32>,
    %c0_9 = arith.constant 0 : index
    %c0_10 = arith.constant 0 : index
    %c0_11 = arith.constant 0 : index
    %11 = vector.load %arg4[%c0_9, %c0_10, %c0_11] : memref<1x4x1xf32, #tpu.memory_space<vmem>>, vector<1x4x1xf32>
    %12 = vector.shape_cast %3 : vector<4x1xf32> to vector<1x4x1xf32>
    %13 = arith.addf %11, %12 : vector<1x4x1xf32>
    %c0_12 = arith.constant 0 : index
    %c0_13 = arith.constant 0 : index
    %c0_14 = arith.constant 0 : index
    %14 = vector.load %arg4[%c0_12, %c0_13, %c0_14] : memref<1x4x1xf32, #tpu.memory_space<vmem>>, vector<1x4x1xf32>
    tpu.vector_store %arg4[%c0_12, %c0_13, %c0_14], %13 {strides = array<i32>} : memref<1x4x1xf32, #tpu.memory_space<vmem>>, vector<1x4x1xf32>,
    return
  }
  func.func @transform_0(%arg0: i32, %arg1: i32) -> (i32, i32) {
    %c1_i32 = arith.constant 1 : i32
    %0 = arith.muli %arg0, %c1_i32 : i32
    %1 = arith.addi %0, %arg1 : i32
    %c0_i32 = arith.constant 0 : i32
    %c0_i32_0 = arith.constant 0 : i32
    return %c0_i32, %1 : i32, i32
  }
  func.func @transform_1(%arg0: i32, %arg1: i32) -> (i32, i32, i32) {
    %c0_i32 = arith.constant 0 : i32
    %c0_i32_0 = arith.constant 0 : i32
    %c0_i32_1 = arith.constant 0 : i32
    return %arg0, %c0_i32, %c0_i32_0 : i32, i32, i32
  }
  func.func @transform_2(%arg0: i32, %arg1: i32) -> (i32, i32, i32) {
    %c0_i32 = arith.constant 0 : i32
    %c0_i32_0 = arith.constant 0 : i32
    %c0_i32_1 = arith.constant 0 : i32
    return %arg0, %c0_i32, %c0_i32_0 : i32, i32, i32
  }
}

module attributes {stable_mosaic.version = 11 : i64} {
  func.func @_conv_relu_gram_kernel(%arg0: i32, %arg1: i32, %arg2: memref<4x896xf32, #tpu.memory_space<vmem>>, %arg3: memref<1x896xf32, #tpu.memory_space<vmem>>, %arg4: memref<8x4xf32, #tpu.memory_space<vmem>>, %arg5: memref<8x1xf32, #tpu.memory_space<vmem>>, %arg6: memref<8x896xf32, #tpu.memory_space<vmem>>, %arg7: memref<1x8x8xf32, #tpu.memory_space<vmem>>, %arg8: memref<1x8x1xf32, #tpu.memory_space<vmem>>) attributes {dimension_semantics = [#tpu.dimension_semantics<parallel>, #tpu.dimension_semantics<arbitrary>], iteration_bounds = array<i64: 1, 1>, scalar_prefetch = 0 : i64, scratch_operands = 0 : i64, tpu.core_type = #tpu.core_type<tc>, window_params = [{transform_indices = @transform_0, window_bounds = array<i64: 4, 896>}, {transform_indices = @transform_1, window_bounds = array<i64: 1, 896>}, {pipeline_mode = #tpu.pipeline_mode<synchronous>, transform_indices = @transform_2, window_bounds = array<i64: 8, 4>}, {pipeline_mode = #tpu.pipeline_mode<synchronous>, transform_indices = @transform_3, window_bounds = array<i64: 8, 1>}, {transform_indices = @transform_4, window_bounds = array<i64: 8, 896>}, {transform_indices = @transform_5, window_bounds = array<i64: 1, 8, 8>}, {transform_indices = @transform_6, window_bounds = array<i64: 1, 8, 1>}]} {
    %c0 = arith.constant 0 : index
    %c0_0 = arith.constant 0 : index
    %0 = vector.load %arg4[%c0, %c0_0] : memref<8x4xf32, #tpu.memory_space<vmem>>, vector<8x4xf32>
    %c0_1 = arith.constant 0 : index
    %c0_2 = arith.constant 0 : index
    %1 = vector.load %arg2[%c0_1, %c0_2] : memref<4x896xf32, #tpu.memory_space<vmem>>, vector<4x896xf32>
    %cst = arith.constant dense<0.000000e+00> : vector<8x896xf32>
    %2 = tpu.matmul %0, %1, %cst {dimension_numbers = #tpu.dot_dimension_numbers<[1], [0], [0], [1], [0, 0, 1, 1], [], []>} : vector<8x4xf32>, vector<4x896xf32>, vector<8x896xf32> -> vector<8x896xf32>
    %c0_3 = arith.constant 0 : index
    %c0_4 = arith.constant 0 : index
    %3 = vector.load %arg5[%c0_3, %c0_4] : memref<8x1xf32, #tpu.memory_space<vmem>>, vector<8x1xf32>
    %4 = vector.broadcast %3 : vector<8x1xf32> to vector<8x896xf32>
    %5 = arith.addf %2, %4 : vector<8x896xf32>
    %cst_5 = arith.constant 0.000000e+00 : f32
    %6 = vector.broadcast %cst_5 : f32 to vector<8x896xf32>
    %7 = arith.maximumf %5, %6 : vector<8x896xf32>
    %c0_6 = arith.constant 0 : index
    %c0_7 = arith.constant 0 : index
    %8 = vector.load %arg3[%c0_6, %c0_7] : memref<1x896xf32, #tpu.memory_space<vmem>>, vector<1x896xf32>
    %9 = vector.broadcast %8 : vector<1x896xf32> to vector<8x896xf32>
    %10 = arith.mulf %7, %9 : vector<8x896xf32>
    %c0_8 = arith.constant 0 : index
    %c0_9 = arith.constant 0 : index
    %11 = vector.load %arg6[%c0_8, %c0_9] : memref<8x896xf32, #tpu.memory_space<vmem>>, vector<8x896xf32>
    tpu.vector_store %arg6[%c0_8, %c0_9], %10 {strides = array<i32>} : memref<8x896xf32, #tpu.memory_space<vmem>>, vector<8x896xf32>,
    %cst_10 = arith.constant dense<0.000000e+00> : vector<8x8xf32>
    %12 = tpu.matmul %10, %10, %cst_10 {dimension_numbers = #tpu.dot_dimension_numbers<[1], [1], [0], [0], [0, 0, 1, 0], [], []>} : vector<8x896xf32>, vector<8x896xf32>, vector<8x8xf32> -> vector<8x8xf32>
    %cst_11 = arith.constant dense<0.000000e+00> : vector<8xf32>
    %13 = vector.multi_reduction <add>, %10, %cst_11 [1] : vector<8x896xf32> to vector<8xf32>
    %14 = vector.shape_cast %13 : vector<8xf32> to vector<8x1xf32>
    %c0_i32 = arith.constant 0 : i32
    %15 = arith.cmpi eq, %arg1, %c0_i32 : i32
    %16 = arith.extui %15 : i1 to i32
    %c0_i32_12 = arith.constant 0 : i32
    %17 = arith.cmpi ne, %16, %c0_i32_12 : i32
    scf.if %17 {
      %cst_25 = arith.constant 0.000000e+00 : f32
      %26 = vector.broadcast %cst_25 : f32 to vector<1x8x8xf32>
      %c0_26 = arith.constant 0 : index
      %c0_27 = arith.constant 0 : index
      %c0_28 = arith.constant 0 : index
      %27 = vector.load %arg7[%c0_26, %c0_27, %c0_28] : memref<1x8x8xf32, #tpu.memory_space<vmem>>, vector<1x8x8xf32>
      tpu.vector_store %arg7[%c0_26, %c0_27, %c0_28], %26 {strides = array<i32>} : memref<1x8x8xf32, #tpu.memory_space<vmem>>, vector<1x8x8xf32>,
      %cst_29 = arith.constant 0.000000e+00 : f32
      %28 = vector.broadcast %cst_29 : f32 to vector<1x8x1xf32>
      %c0_30 = arith.constant 0 : index
      %c0_31 = arith.constant 0 : index
      %c0_32 = arith.constant 0 : index
      %29 = vector.load %arg8[%c0_30, %c0_31, %c0_32] : memref<1x8x1xf32, #tpu.memory_space<vmem>>, vector<1x8x1xf32>
      tpu.vector_store %arg8[%c0_30, %c0_31, %c0_32], %28 {strides = array<i32>} : memref<1x8x1xf32, #tpu.memory_space<vmem>>, vector<1x8x1xf32>,
    } else {
    }
    %c0_13 = arith.constant 0 : index
    %c0_14 = arith.constant 0 : index
    %c0_15 = arith.constant 0 : index
    %18 = vector.load %arg7[%c0_13, %c0_14, %c0_15] : memref<1x8x8xf32, #tpu.memory_space<vmem>>, vector<1x8x8xf32>
    %19 = vector.shape_cast %12 : vector<8x8xf32> to vector<1x8x8xf32>
    %20 = arith.addf %18, %19 : vector<1x8x8xf32>
    %c0_16 = arith.constant 0 : index
    %c0_17 = arith.constant 0 : index
    %c0_18 = arith.constant 0 : index
    %21 = vector.load %arg7[%c0_16, %c0_17, %c0_18] : memref<1x8x8xf32, #tpu.memory_space<vmem>>, vector<1x8x8xf32>
    tpu.vector_store %arg7[%c0_16, %c0_17, %c0_18], %20 {strides = array<i32>} : memref<1x8x8xf32, #tpu.memory_space<vmem>>, vector<1x8x8xf32>,
    %c0_19 = arith.constant 0 : index
    %c0_20 = arith.constant 0 : index
    %c0_21 = arith.constant 0 : index
    %22 = vector.load %arg8[%c0_19, %c0_20, %c0_21] : memref<1x8x1xf32, #tpu.memory_space<vmem>>, vector<1x8x1xf32>
    %23 = vector.shape_cast %14 : vector<8x1xf32> to vector<1x8x1xf32>
    %24 = arith.addf %22, %23 : vector<1x8x1xf32>
    %c0_22 = arith.constant 0 : index
    %c0_23 = arith.constant 0 : index
    %c0_24 = arith.constant 0 : index
    %25 = vector.load %arg8[%c0_22, %c0_23, %c0_24] : memref<1x8x1xf32, #tpu.memory_space<vmem>>, vector<1x8x1xf32>
    tpu.vector_store %arg8[%c0_22, %c0_23, %c0_24], %24 {strides = array<i32>} : memref<1x8x1xf32, #tpu.memory_space<vmem>>, vector<1x8x1xf32>,
    return
  }
  func.func @transform_0(%arg0: i32, %arg1: i32) -> (i32, i32) {
    %c1_i32 = arith.constant 1 : i32
    %0 = arith.muli %arg0, %c1_i32 : i32
    %1 = arith.addi %0, %arg1 : i32
    %c0_i32 = arith.constant 0 : i32
    %c0_i32_0 = arith.constant 0 : i32
    return %c0_i32, %1 : i32, i32
  }
  func.func @transform_1(%arg0: i32, %arg1: i32) -> (i32, i32) {
    %c1_i32 = arith.constant 1 : i32
    %0 = arith.muli %arg0, %c1_i32 : i32
    %1 = arith.addi %0, %arg1 : i32
    %c0_i32 = arith.constant 0 : i32
    %c0_i32_0 = arith.constant 0 : i32
    return %c0_i32, %1 : i32, i32
  }
  func.func @transform_2(%arg0: i32, %arg1: i32) -> (i32, i32) {
    %c0_i32 = arith.constant 0 : i32
    %c0_i32_0 = arith.constant 0 : i32
    %c0_i32_1 = arith.constant 0 : i32
    return %c0_i32, %c0_i32_0 : i32, i32
  }
  func.func @transform_3(%arg0: i32, %arg1: i32) -> (i32, i32) {
    %c0_i32 = arith.constant 0 : i32
    %c0_i32_0 = arith.constant 0 : i32
    %c0_i32_1 = arith.constant 0 : i32
    return %c0_i32, %c0_i32_0 : i32, i32
  }
  func.func @transform_4(%arg0: i32, %arg1: i32) -> (i32, i32) {
    %c1_i32 = arith.constant 1 : i32
    %0 = arith.muli %arg0, %c1_i32 : i32
    %1 = arith.addi %0, %arg1 : i32
    %c0_i32 = arith.constant 0 : i32
    %c0_i32_0 = arith.constant 0 : i32
    return %c0_i32, %1 : i32, i32
  }
  func.func @transform_5(%arg0: i32, %arg1: i32) -> (i32, i32, i32) {
    %c0_i32 = arith.constant 0 : i32
    %c0_i32_0 = arith.constant 0 : i32
    %c0_i32_1 = arith.constant 0 : i32
    return %arg0, %c0_i32, %c0_i32_0 : i32, i32, i32
  }
  func.func @transform_6(%arg0: i32, %arg1: i32) -> (i32, i32, i32) {
    %c0_i32 = arith.constant 0 : i32
    %c0_i32_0 = arith.constant 0 : i32
    %c0_i32_1 = arith.constant 0 : i32
    return %arg0, %c0_i32, %c0_i32_0 : i32, i32, i32
  }
}

module attributes {stable_mosaic.version = 11 : i64} {
  func.func @_conv_relu_kernel(%arg0: i32, %arg1: memref<8x896xf32, #tpu.memory_space<vmem>>, %arg2: memref<8x8xf32, #tpu.memory_space<vmem>>, %arg3: memref<8x1xf32, #tpu.memory_space<vmem>>, %arg4: memref<8x896xf32, #tpu.memory_space<vmem>>) attributes {dimension_semantics = [#tpu.dimension_semantics<parallel>], iteration_bounds = array<i64: 1>, scalar_prefetch = 0 : i64, scratch_operands = 0 : i64, tpu.core_type = #tpu.core_type<tc>, window_params = [{transform_indices = @transform_0, window_bounds = array<i64: 8, 896>}, {pipeline_mode = #tpu.pipeline_mode<synchronous>, transform_indices = @transform_1, window_bounds = array<i64: 8, 8>}, {pipeline_mode = #tpu.pipeline_mode<synchronous>, transform_indices = @transform_2, window_bounds = array<i64: 8, 1>}, {transform_indices = @transform_3, window_bounds = array<i64: 8, 896>}]} {
    %c0 = arith.constant 0 : index
    %c0_0 = arith.constant 0 : index
    %0 = vector.load %arg2[%c0, %c0_0] : memref<8x8xf32, #tpu.memory_space<vmem>>, vector<8x8xf32>
    %c0_1 = arith.constant 0 : index
    %c0_2 = arith.constant 0 : index
    %1 = vector.load %arg1[%c0_1, %c0_2] : memref<8x896xf32, #tpu.memory_space<vmem>>, vector<8x896xf32>
    %cst = arith.constant dense<0.000000e+00> : vector<8x896xf32>
    %2 = tpu.matmul %0, %1, %cst {dimension_numbers = #tpu.dot_dimension_numbers<[1], [0], [0], [1], [0, 0, 1, 1], [], []>} : vector<8x8xf32>, vector<8x896xf32>, vector<8x896xf32> -> vector<8x896xf32>
    %c0_3 = arith.constant 0 : index
    %c0_4 = arith.constant 0 : index
    %3 = vector.load %arg3[%c0_3, %c0_4] : memref<8x1xf32, #tpu.memory_space<vmem>>, vector<8x1xf32>
    %4 = vector.broadcast %3 : vector<8x1xf32> to vector<8x896xf32>
    %5 = arith.addf %2, %4 : vector<8x896xf32>
    %cst_5 = arith.constant 0.000000e+00 : f32
    %6 = vector.broadcast %cst_5 : f32 to vector<8x896xf32>
    %7 = arith.maximumf %5, %6 : vector<8x896xf32>
    %c0_6 = arith.constant 0 : index
    %c0_7 = arith.constant 0 : index
    %8 = vector.load %arg4[%c0_6, %c0_7] : memref<8x896xf32, #tpu.memory_space<vmem>>, vector<8x896xf32>
    tpu.vector_store %arg4[%c0_6, %c0_7], %7 {strides = array<i32>} : memref<8x896xf32, #tpu.memory_space<vmem>>, vector<8x896xf32>,
    return
  }
  func.func @transform_0(%arg0: i32) -> (i32, i32) {
    %c0_i32 = arith.constant 0 : i32
    %c0_i32_0 = arith.constant 0 : i32
    return %c0_i32, %arg0 : i32, i32
  }
  func.func @transform_1(%arg0: i32) -> (i32, i32) {
    %c0_i32 = arith.constant 0 : i32
    %c0_i32_0 = arith.constant 0 : i32
    %c0_i32_1 = arith.constant 0 : i32
    return %c0_i32, %c0_i32_0 : i32, i32
  }
  func.func @transform_2(%arg0: i32) -> (i32, i32) {
    %c0_i32 = arith.constant 0 : i32
    %c0_i32_0 = arith.constant 0 : i32
    %c0_i32_1 = arith.constant 0 : i32
    return %c0_i32, %c0_i32_0 : i32, i32
  }
  func.func @transform_3(%arg0: i32) -> (i32, i32) {
    %c0_i32 = arith.constant 0 : i32
    %c0_i32_0 = arith.constant 0 : i32
    return %c0_i32, %arg0 : i32, i32
  }
}

</mosaic_0001>

<bundles_post_ra>
// kernel: unet_block.5
= control target key start
LH: loop header
LB: loop body
LE: loop exit
PB: predicated region body
PF: predicated region fallthrough
CT: control target
= control target key end

     0   :  { %vm28_vm0 = vcmask 64512   ;;  %v199_v3 = vmov 0   ;;  %s275_s0 = inlined_call_operand.vmem [shape: f32[8,896], index: 0, kind: input, shape index: {}]   ;;  %s276_s1 = inlined_call_operand.vmem [shape: f32[8,8], index: 1, kind: input, shape index: {}]   ;;  %s277_s2 = inlined_call_operand.vmem [shape: f32[8,1], index: 2, kind: input, shape index: {}]   ;;  %s278_s3 = inlined_call_operand.vmem [shape: f32[8,896], index: 3, kind: output, shape index: {}]  }
   0x1   :  { %v17_v0 = vld [vmem:[%s275_s0 + $0x10] sm:$0xff]  ;;  %v14_v1 = vld [vmem:[%s276_s1] sm:$0xff]  ;;  %198 = vset.pattern.permute.xlu0 %v199_v3  ;;  %v16_v5 = vld [vmem:[%s275_s0 + $0x8] sm:$0xff] }
   0x2   :  { %v21_v2 = vld [vmem:[%s275_s0 + $0x30] sm:$0xff]  ;;  %87 = vmatpush.msra.mxu2 %v17_v0  ;;  %v15_v4 = vld [vmem:[%s275_s0] sm:$0xff]  ;;  %v20_v7 = vld [vmem:[%s275_s0 + $0x28] sm:$0xff]  ;;  %67 = vmatpush.msra.mxu1 %v16_v5 }
   0x3   :  { %192 = vmatmul.msk.f32.vlgmr.msra.gmra.mxu2 %vm28_vm0, %v14_v1  ;;  %47 = vmatpush.msra.mxu0 %v15_v4  ;;  %v19_v6 = vld [vmem:[%s275_s0 + $0x20] sm:$0xff]  ;;  %v18_v8 = vld [vmem:[%s275_s0 + $0x18] sm:$0xff] }
   0x4   :  { %167 = vmatpush.msrb.mxu2 %v21_v2  ;;  %v22_v9 = vld [vmem:[%s277_s2] sm:$0xff]  ;;  %190 = vmatmul.msk.f32.vlgmr.msra.gmra.mxu0 %vm28_vm0, %v14_v1 }
   0x5   :  { %191 = vmatmul.msk.f32.vlgmr.msra.gmra.mxu1 %vm28_vm0, %v14_v1  ;;  %127 = vmatpush.msrb.mxu0 %v19_v6 }
   0x6   :  { %147 = vmatpush.msrb.mxu1 %v20_v7  ;;  %107 = vmatpush.msra.mxu3 %v18_v8 }
   0x7   :  { %25 = vperm.xlu0 %198, %v22_v9   ;;  %193 = vmatmul.msk.f32.vlgmr.msra.gmra.mxu3 %vm28_vm0, %v14_v1 }
   0xb   :  { %196 = vmatmul.msk.f32.vlgmr.msrb.gmra.mxu2 %vm28_vm0, %v14_v1 }
   0xc   :  { %194 = vmatmul.msk.f32.vlgmr.msrb.gmra.mxu0 %vm28_vm0, %v14_v1 }
   0xd   :  { %195 = vmatmul.msk.f32.vlgmr.msrb.gmra.mxu1 %vm28_vm0, %v14_v1 }
  0x79   :  { %v26_v10 = vpop.permute.xlu0 %25 }
  0x81   :  { %v49_v11 = vpop.f32.mrf.mxu0 }
  0x82   :  { %v69_v12 = vpop.f32.mrf.mxu1  ;;  %v50_v13 = vadd.f32 %v49_v11, %v26_v10 }
  0x83   :  { %v70_v14 = vadd.f32 %v69_v12, %v26_v10 }
  0x84   :  { %v172_v15 = vmax.f32 %v50_v13, 0.0 }
  0x85   :  { %v173_v16 = vmax.f32 %v70_v14, 0.0 }
  0x86   :  { %v89_v17 = vpop.f32.mrf.mxu2  ;;  %179 = vst [vmem:[%s278_s3] sm:$0xff] %v172_v15 }
  0x87   :  { %v90_v18 = vadd.f32 %v89_v17, %v26_v10  ;;  %180 = vst [vmem:[%s278_s3 + $0x8] sm:$0xff] %v173_v16 }
  0x89   :  { %v174_v19 = vmax.f32 %v90_v18, 0.0  ;;  %v129_v20 = vpop.f32.mrf.mxu0 }
  0x8a   :  { %v149_v21 = vpop.f32.mrf.mxu1  ;;  %v109_v22 = vpop.f32.mrf.mxu3  ;;  %v130_v23 = vadd.f32 %v129_v20, %v26_v10 }
  0x8b   :  { %181 = vst [vmem:[%s278_s3 + $0x10] sm:$0xff] %v174_v19  ;;  %v150_v24 = vadd.f32 %v149_v21, %v26_v10  ;;  %v110_v25 = vadd.f32 %v109_v22, %v26_v10 }
  0x8c   :  { %v176_v26 = vmax.f32 %v130_v23, 0.0 }
  0x8d   :  { %v177_v27 = vmax.f32 %v150_v24, 0.0  ;;  %v175_v28 = vmax.f32 %v110_v25, 0.0 }
  0x8e   :  { %v169_v29 = vpop.f32.mrf.mxu2  ;;  %183 = vst [vmem:[%s278_s3 + $0x20] sm:$0xff] %v176_v26 }
  0x8f   :  { %v170_v30 = vadd.f32 %v169_v29, %v26_v10  ;;  %182 = vst [vmem:[%s278_s3 + $0x18] sm:$0xff] %v175_v28 }
  0x90   :  { %184 = vst [vmem:[%s278_s3 + $0x28] sm:$0xff] %v177_v27 }
  0x91   :  { %v178_v31 = vmax.f32 %v170_v30, 0.0 }
  0x93   :  { %185 = vst [vmem:[%s278_s3 + $0x30] sm:$0xff] %v178_v31 }

// kernel: unet_block.3
= control target key start
LH: loop header
LB: loop body
LE: loop exit
PB: predicated region body
PF: predicated region fallthrough
CT: control target
= control target key end

     0   :  { %vm243_vm0 = vcmask 1043456   ;;  %vm263_vm1 = vcmask 27648   ;;  %vm265_vm2 = vcmask 3072   ;;  %v290_v38 = vmov 0.0   ;;  %s347_s0 = inlined_call_operand.vmem [shape: f32[4,896], index: 0, kind: input, shape index: {}]   ;;  %s348_s1 = inlined_call_operand.vmem [shape: f32[1,4,4], index: 1, kind: output, shape index: {0}]   ;;  %s349_s2 = inlined_call_operand.vmem [shape: f32[1,4,1], index: 2, kind: output, shape index: {1}]  }
   0x1   :  { %v33_v0 = vld [vmem:[%s347_s0 + $0x8] sm:$0xff]  ;;  %v32_v1 = vld [vmem:[%s347_s0] sm:$0xff]  ;;  %v35_v2 = vld [vmem:[%s347_s0 + $0x18] sm:$0xf]  ;;  %264 = vst.msk [vmem:[%s348_s1] sm:$0xf] %vm263_vm1, %v290_v38 }
   0x2   :  { %42 = vst [vmem:[#allocation1 + $0x10] ss:$2 sm:$0xff] %v33_v0  ;;  %v34_v3 = vld [vmem:[%s347_s0 + $0x10] sm:$0xff] }
   0x3   :  { %40 = vst [vmem:[#allocation1] ss:$2 sm:$0xff] %v32_v1 }
   0x4   :  { %46 = vst [vmem:[#allocation1 + $0x30] ss:$2 sm:$0xff] %v35_v2 }
   0x5   :  { %44 = vst [vmem:[#allocation1 + $0x20] ss:$2 sm:$0xff] %v34_v3 }
   0x6   :  { %266 = vst.msk [vmem:[%s349_s2] sm:$0xf] %vm265_vm2, %v290_v38 }
   0x8   :  { %v267_v54 = vld [vmem:[%s348_s1] sm:$0xf] }
   0x9   :  { %v49_v4 = vld.sshfl [vmem:[#allocation1 + $0x10] sm:$0xff pattern:$0x75316420]  ;;  %v50_v5 = vld.sshfl [vmem:[#allocation1 + $0x18] sm:$0xff pattern:$0x75316420] }
   0xa   :  { %63 = vst [vmem:[#allocation1 + $0x10] ss:$2 sm:$0xff] %v33_v0  ;;  %v47_v6 = vld.sshfl [vmem:[#allocation1] sm:$0xff pattern:$0x75316420] }
   0xb   :  { %v48_v7 = vld.sshfl [vmem:[#allocation1 + $0x8] sm:$0xff pattern:$0x75316420]  ;;  %v53_v8 = vld.sshfl [vmem:[#allocation1 + $0x30] sm:$0xff pattern:$0x75316420] }
   0xc   :  { %61 = vst [vmem:[#allocation1] ss:$2 sm:$0xff] %v32_v1  ;;  %v51_v9 = vld.sshfl [vmem:[#allocation1 + $0x20] sm:$0xff pattern:$0x75316420] }
   0xd   :  { %67 = vst [vmem:[#allocation1 + $0x30] ss:$2 sm:$0xff] %v35_v2  ;;  %v52_v10 = vld.sshfl [vmem:[#allocation1 + $0x28] sm:$0xff pattern:$0x75316420] }
   0xe   :  { %65 = vst [vmem:[#allocation1 + $0x20] ss:$2 sm:$0xff] %v34_v3  ;;  %v271_v46 = vld [vmem:[%s349_s2] sm:$0xf] }
  0x11   :  { %v70_v11 = vld.sshfl [vmem:[#allocation1 + $0x10] sm:$0xff pattern:$0x75316420]  ;;  %v71_v12 = vld.sshfl [vmem:[#allocation1 + $0x18] sm:$0xff pattern:$0x75316420] }
  0x12   :  { %137 = vmatpush.xpose.msra.mxu2 %v70_v11  ;;  %157 = vmatpush.xpose.msra.mxu3 %v71_v12  ;;  %224 = vst [vmem:[#allocation1 + $0x10] ss:$2 sm:$0xff] %v33_v0 }
  0x13   :  { %v68_v13 = vld.sshfl [vmem:[#allocation1] sm:$0xff pattern:$0x75316420]  ;;  %v69_v14 = vld.sshfl [vmem:[#allocation1 + $0x8] sm:$0xff pattern:$0x75316420] }
  0x14   :  { %97 = vmatpush.xpose.msra.mxu0 %v68_v13  ;;  %117 = vmatpush.xpose.msra.mxu1 %v69_v14  ;;  %222 = vst [vmem:[#allocation1] ss:$2 sm:$0xff] %v32_v1  ;;  %v74_v15 = vld.sshfl [vmem:[#allocation1 + $0x30] sm:$0xff pattern:$0x75316420] }
  0x15   :  { %138 = vmatmul.f32.vlgmr.msra.gmra.mxu2 %v49_v4  ;;  %228 = vst [vmem:[#allocation1 + $0x30] ss:$2 sm:$0xff] %v35_v2  ;;  %158 = vmatmul.f32.vlgmr.msra.gmra.mxu3 %v50_v5  ;;  %v72_v16 = vld.sshfl [vmem:[#allocation1 + $0x20] sm:$0xff pattern:$0x75316420] }
  0x16   :  { %217 = vmatpush.xpose.msrb.mxu2 %v74_v15  ;;  %v73_v17 = vld.sshfl [vmem:[#allocation1 + $0x28] sm:$0xff pattern:$0x75316420] }
  0x17   :  { %98 = vmatmul.f32.vlgmr.msra.gmra.mxu0 %v47_v6  ;;  %118 = vmatmul.f32.vlgmr.msra.gmra.mxu1 %v48_v7  ;;  %226 = vst [vmem:[#allocation1 + $0x20] ss:$2 sm:$0xff] %v34_v3 }
  0x18   :  { %177 = vmatpush.xpose.msrb.mxu0 %v72_v16  ;;  %197 = vmatpush.xpose.msrb.mxu1 %v73_v17 }
  0x19   :  { %v231_v18 = vld.sshfl [vmem:[#allocation1 + $0x10] sm:$0xff pattern:$0x75316420]  ;;  %v232_v19 = vld.sshfl [vmem:[#allocation1 + $0x18] sm:$0xff pattern:$0x75316420] }
  0x1a   :  { %v247_v24 = vsel %vm243_vm0, %v231_v18, 0.0  ;;  %v249_v27 = vsel %vm243_vm0, %v232_v19, 0.0 }
  0x1b   :  { %v229_v20 = vld.sshfl [vmem:[#allocation1] sm:$0xff pattern:$0x75316420]  ;;  %v230_v21 = vld.sshfl [vmem:[#allocation1 + $0x8] sm:$0xff pattern:$0x75316420] }
  0x1c   :  { %v244_v22 = vsel %vm243_vm0, %v229_v20, 0.0  ;;  %v245_v23 = vsel %vm243_vm0, %v230_v21, 0.0  ;;  %v235_v31 = vld.sshfl [vmem:[#allocation1 + $0x30] sm:$0xff pattern:$0x75316420] }
  0x1d   :  { %218 = vmatmul.f32.vlgmr.msrb.gmra.mxu2 %v53_v8  ;;  %v246_v25 = vadd.f32 %v245_v23, %v244_v22  ;;  %v255_v35 = vsel %vm243_vm0, %v235_v31, 0.0 }
  0x1e   :  { %v233_v26 = vld.sshfl [vmem:[#allocation1 + $0x20] sm:$0xff pattern:$0x75316420]  ;;  %v234_v28 = vld.sshfl [vmem:[#allocation1 + $0x28] sm:$0xff pattern:$0x75316420] }
  0x1f   :  { %178 = vmatmul.f32.vlgmr.msrb.gmra.mxu0 %v51_v9  ;;  %198 = vmatmul.f32.vlgmr.msrb.gmra.mxu1 %v52_v10  ;;  %v248_v29 = vadd.f32 %v247_v24, %v246_v25  ;;  %v251_v30 = vsel %vm243_vm0, %v233_v26, 0.0  ;;  %v253_v33 = vsel %vm243_vm0, %v234_v28, 0.0 }
  0x21   :  { %v250_v32 = vadd.f32 %v249_v27, %v248_v29 }
  0x23   :  { %v252_v34 = vadd.f32 %v251_v30, %v250_v32 }
  0x25   :  { %v254_v36 = vadd.f32 %v253_v33, %v252_v34 }
  0x27   :  { %v256_v37 = vadd.f32 %v255_v35, %v254_v36 }
  0x29   :  { %257 = vadd.xlane.f32.xlu0 %v256_v37 }
  0x94   :  { %v99_v39 = vpop.f32.mrf.mxu0  ;;  %v119_v40 = vpop.f32.mrf.mxu1 }
  0x95   :  { %v120_v41 = vadd.f32 %v119_v40, %v99_v39 }
  0x98   :  { %v139_v42 = vpop.f32.mrf.mxu2  ;;  %v159_v43 = vpop.f32.mrf.mxu3 }
  0x99   :  { %v140_v44 = vadd.f32 %v139_v42, %v120_v41 }
  0x9b   :  { %v160_v45 = vadd.f32 %v159_v43, %v140_v44 }
  0x9c   :  { %v179_v47 = vpop.f32.mrf.mxu0  ;;  %v199_v48 = vpop.f32.mrf.mxu1 }
  0x9d   :  { %v180_v49 = vadd.f32 %v179_v47, %v160_v45  ;;  %v258_v50 = vpop.xlane.xlu0 %257 }
  0x9e   :  { %v272_v51 = vadd.f32 %v271_v46, %v258_v50 }
  0x9f   :  { %v200_v52 = vadd.f32 %v199_v48, %v180_v49 }
  0xa0   :  { %v219_v53 = vpop.f32.mrf.mxu2  ;;  %274 = vst.msk [vmem:[%s349_s2] sm:$0xf] %vm265_vm2, %v272_v51 }
  0xa1   :  { %v220_v55 = vadd.f32 %v219_v53, %v200_v52 }
  0xa3   :  { %v268_v56 = vadd.f32 %v267_v54, %v220_v55 }
  0xa5   :  { %270 = vst.msk [vmem:[%s348_s1] sm:$0xf] %vm263_vm1, %v268_v56 }

// kernel: unet_block.4
= control target key start
LH: loop header
LB: loop body
LE: loop exit
PB: predicated region body
PF: predicated region fallthrough
CT: control target
= control target key end

     0   :  { %v524_v2 = vmov 0   ;;  %vm108_vm0 = vcmask 1043456   ;;  %vm104_vm1 = vcmask 31744   ;;  %vm454_vm2 = vcmask 7168   ;;  %s637_s0 = inlined_call_operand.vmem [shape: f32[4,896], index: 0, kind: input, shape index: {}]   ;;  %s638_s3 = inlined_call_operand.vmem [shape: f32[8,1], index: 3, kind: input, shape index: {}]   ;;  %s639_s2 = inlined_call_operand.vmem [shape: f32[8,4], index: 2, kind: input, shape index: {}]   ;;  %s640_s1 = inlined_call_operand.vmem [shape: f32[1,896], index: 1, kind: input, shape index: {}]   ;;  %s641_s4 = inlined_call_operand.vmem [shape: f32[8,896], index: 4, kind: output, shape index: {0}]   ;;  %s642_s6 = inlined_call_operand.vmem [shape: f32[1,8,1], index: 6, kind: output, shape index: {2}]   ;;  %s643_s5 = inlined_call_operand.vmem [shape: f32[1,8,8], index: 5, kind: output, shape index: {1}]  }
   0x1   :  { %v76_v0 = vld [vmem:[%s637_s0] sm:$0xff]  ;;  %v77_v1 = vld [vmem:[%s637_s0 + $0x8] sm:$0xff]  ;;  %523 = vset.pattern.permute.xlu0 %v524_v2  ;;  %v78_v3 = vld [vmem:[%s637_s0 + $0x10] sm:$0xff]  ;;  %v525_v57 = vmov 0.0   ;;  %vm452_vm3 = vcmask 64512  }
   0x2   :  { %90 = vst [vmem:[#allocation1] ss:$2 sm:$0xff] %v76_v0  ;;  %v79_v4 = vld [vmem:[%s637_s0 + $0x18] sm:$0xf]  ;;  %v80_v5 = vld [vmem:[%s638_s3] sm:$0xff] }
   0x3   :  { %92 = vst [vmem:[#allocation1 + $0x10] ss:$2 sm:$0xff] %v77_v1  ;;  %83 = vperm.xlu0 %523, %v80_v5   ;;  %v75_v6 = vld [vmem:[%s639_s2] sm:$0xff] }
   0x4   :  { %94 = vst [vmem:[#allocation1 + $0x20] ss:$2 sm:$0xff] %v78_v3  ;;  %v270_v15 = vld [vmem:[%s640_s1] sm:$0xff] }
   0x5   :  { %96 = vst [vmem:[#allocation1 + $0x30] ss:$2 sm:$0xff] %v79_v4  ;;  %v272_v19 = vperm.slane %v270_v15, 0  ;;  %v273_v21 = vperm.slane %v270_v15, 1  ;;  %v274_v29 = vperm.slane %v270_v15, 2  ;;  %v275_v31 = vperm.slane %v270_v15, 3 }
   0x6   :  { %v276_v35 = vperm.slane %v270_v15, 4  ;;  %v277_v37 = vperm.slane %v270_v15, 5  ;;  %v278_v50 = vperm.slane %v270_v15, 6  ;;  %455 = vst.msk [vmem:[%s642_s6] sm:$0xff] %vm454_vm2, %v525_v57 }
   0x7   :  { %453 = vst.msk [vmem:[%s643_s5] sm:$0xff] %vm452_vm3, %v525_v57 }
   0x9   :  { %v97_v7 = vld.sshfl [vmem:[#allocation1] sm:$0xff pattern:$0x75316420]  ;;  %v98_v8 = vld.sshfl [vmem:[#allocation1 + $0x8] sm:$0xff pattern:$0x75316420] }
   0xa   :  { %507 = vmatpush.msk.msra.mxu0 %vm108_vm0, %v97_v7  ;;  %509 = vmatpush.msk.msra.mxu1 %vm108_vm0, %v98_v8  ;;  %v99_v9 = vld.sshfl [vmem:[#allocation1 + $0x10] sm:$0xff pattern:$0x75316420]  ;;  %v100_v10 = vld.sshfl [vmem:[#allocation1 + $0x18] sm:$0xff pattern:$0x75316420] }
   0xb   :  { %511 = vmatpush.msk.msra.mxu2 %vm108_vm0, %v99_v9  ;;  %513 = vmatpush.msk.msra.mxu3 %vm108_vm0, %v100_v10  ;;  %v101_v11 = vld.sshfl [vmem:[#allocation1 + $0x20] sm:$0xff pattern:$0x75316420]  ;;  %v102_v12 = vld.sshfl [vmem:[#allocation1 + $0x28] sm:$0xff pattern:$0x75316420] }
   0xc   :  { %508 = vmatmul.msk.f32.vlgmr.msra.gmra.mxu0 %vm104_vm1, %v75_v6  ;;  %510 = vmatmul.msk.f32.vlgmr.msra.gmra.mxu1 %vm104_vm1, %v75_v6  ;;  %v103_v13 = vld.sshfl [vmem:[#allocation1 + $0x30] sm:$0xff pattern:$0x75316420] }
   0xd   :  { %512 = vmatmul.msk.f32.vlgmr.msra.gmra.mxu2 %vm104_vm1, %v75_v6  ;;  %514 = vmatmul.msk.f32.vlgmr.msra.gmra.mxu3 %vm104_vm1, %v75_v6  ;;  %v460_v58 = vld [vmem:[%s642_s6] sm:$0xff] }
   0xe   :  { %515 = vmatpush.msk.msrb.mxu0 %vm108_vm0, %v101_v11  ;;  %517 = vmatpush.msk.msrb.mxu1 %vm108_vm0, %v102_v12  ;;  %v456_v9 = vld [vmem:[%s643_s5] sm:$0xff] }
   0xf   :  { %519 = vmatpush.msk.msrb.mxu2 %vm108_vm0, %v103_v13 }
  0x14   :  { %516 = vmatmul.msk.f32.vlgmr.msrb.gmra.mxu0 %vm104_vm1, %v75_v6  ;;  %518 = vmatmul.msk.f32.vlgmr.msrb.gmra.mxu1 %vm104_vm1, %v75_v6 }
  0x15   :  { %520 = vmatmul.msk.f32.vlgmr.msrb.gmra.mxu2 %vm104_vm1, %v75_v6 }
  0x75   :  { %v84_v14 = vpop.permute.xlu0 %83 }
  0x89   :  { %v140_v16 = vpop.f32.mrf.mxu0  ;;  %v160_v17 = vpop.f32.mrf.mxu1 }
  0x8a   :  { %v141_v18 = vadd.f32 %v140_v16, %v84_v14  ;;  %v161_v20 = vadd.f32 %v160_v17, %v84_v14 }
  0x8c   :  { %v263_v22 = vmax.f32 %v141_v18, 0.0  ;;  %v264_v23 = vmax.f32 %v161_v20, 0.0 }
  0x8e   :  { %v286_v24 = vmul.f32 %v272_v19, %v263_v22  ;;  %v287_v25 = vmul.f32 %v273_v21, %v264_v23 }
  0x90   :  { %293 = vst [vmem:[%s641_s4] sm:$0xff] %v286_v24  ;;  %v180_v26 = vpop.f32.mrf.mxu2  ;;  %v200_v27 = vpop.f32.mrf.mxu3  ;;  %315 = vmatpush.xpose.msrb.mxu3 %v286_v24  ;;  %335 = vmatpush.xpose.msra.mxu0 %v287_v25  ;;  %v440_v42 = vadd.f32 %v287_v25, %v286_v24 }
  0x91   :  { %294 = vst [vmem:[%s641_s4 + $0x8] sm:$0xff] %v287_v25  ;;  %v181_v28 = vadd.f32 %v180_v26, %v84_v14  ;;  %v201_v30 = vadd.f32 %v200_v27, %v84_v14  ;;  %v220_v32 = vpop.f32.mrf.mxu0  ;;  %v240_v33 = vpop.f32.mrf.mxu1 }
  0x92   :  { %v221_v34 = vadd.f32 %v220_v32, %v84_v14  ;;  %v241_v36 = vadd.f32 %v240_v33, %v84_v14 }
  0x93   :  { %v265_v38 = vmax.f32 %v181_v28, 0.0  ;;  %v266_v39 = vmax.f32 %v201_v30, 0.0  ;;  %316 = vmatmul.f32.vlgmr.msrb.gmra.mxu3 %v286_v24  ;;  %336 = vmatmul.f32.vlgmr.msra.gmra.mxu0 %v287_v25 }
  0x94   :  { %v267_v40 = vmax.f32 %v221_v34, 0.0  ;;  %v268_v41 = vmax.f32 %v241_v36, 0.0 }
  0x95   :  { %v288_v43 = vmul.f32 %v274_v29, %v265_v38  ;;  %v289_v44 = vmul.f32 %v275_v31, %v266_v39 }
  0x96   :  { %v290_v45 = vmul.f32 %v276_v35, %v267_v40  ;;  %v291_v46 = vmul.f32 %v277_v37, %v268_v41 }
  0x97   :  { %295 = vst [vmem:[%s641_s4 + $0x10] sm:$0xff] %v288_v43  ;;  %355 = vmatpush.xpose.msra.mxu1 %v288_v43  ;;  %375 = vmatpush.xpose.msra.mxu2 %v289_v44  ;;  %v441_v47 = vadd.f32 %v440_v42, %v288_v43 }
  0x98   :  { %296 = vst [vmem:[%s641_s4 + $0x18] sm:$0xff] %v289_v44  ;;  %v260_v48 = vpop.f32.mrf.mxu2  ;;  %395 = vmatpush.xpose.msra.mxu3 %v290_v45  ;;  %415 = vmatpush.xpose.msrb.mxu0 %v291_v46 }
  0x99   :  { %297 = vst [vmem:[%s641_s4 + $0x20] sm:$0xff] %v290_v45  ;;  %v261_v49 = vadd.f32 %v260_v48, %v84_v14  ;;  %v442_v51 = vadd.f32 %v441_v47, %v289_v44 }
  0x9a   :  { %298 = vst [vmem:[%s641_s4 + $0x28] sm:$0xff] %v291_v46  ;;  %356 = vmatmul.f32.vlgmr.msra.gmra.mxu1 %v288_v43  ;;  %376 = vmatmul.f32.vlgmr.msra.gmra.mxu2 %v289_v44 }
  0x9b   :  { %v269_v52 = vmax.f32 %v261_v49, 0.0  ;;  %396 = vmatmul.f32.vlgmr.msra.gmra.mxu3 %v290_v45  ;;  %416 = vmatmul.f32.vlgmr.msrb.gmra.mxu0 %v291_v46  ;;  %v443_v53 = vadd.f32 %v442_v51, %v290_v45 }
  0x9d   :  { %v292_v54 = vmul.f32 %v278_v50, %v269_v52  ;;  %v444_v55 = vadd.f32 %v443_v53, %v291_v46 }
  0x9f   :  { %299 = vst [vmem:[%s641_s4 + $0x30] sm:$0xff] %v292_v54  ;;  %435 = vmatpush.xpose.msrb.mxu1 %v292_v54  ;;  %v445_v56 = vadd.f32 %v444_v55, %v292_v54 }
  0xa1   :  { %446 = vadd.xlane.f32.xlu0 %v445_v56 }
  0xa2   :  { %436 = vmatmul.f32.vlgmr.msrb.gmra.mxu1 %v292_v54 }
 0x110   :  { %v337_v62 = vpop.f32.mrf.mxu0 }
 0x114   :  { %v447_v59 = vpop.xlane.xlu0 %446 }
 0x115   :  { %v461_v60 = vadd.f32 %v460_v58, %v447_v59 }
 0x116   :  { %v317_v61 = vpop.f32.mrf.mxu3 }
 0x117   :  { %463 = vst.msk [vmem:[%s642_s6] sm:$0xff] %vm454_vm2, %v461_v60  ;;  %v338_v63 = vadd.f32 %v337_v62, %v317_v61  ;;  %v357_v0 = vpop.f32.mrf.mxu1 }
 0x118   :  { %v417_v6 = vpop.f32.mrf.mxu0 }
 0x119   :  { %v358_v1 = vadd.f32 %v357_v0, %v338_v63 }
 0x11d   :  { %v377_v2 = vpop.f32.mrf.mxu2 }
 0x11e   :  { %v378_v3 = vadd.f32 %v377_v2, %v358_v1  ;;  %v397_v4 = vpop.f32.mrf.mxu3 }
 0x11f   :  { %v437_v8 = vpop.f32.mrf.mxu1 }
 0x120   :  { %v398_v5 = vadd.f32 %v397_v4, %v378_v3 }
 0x122   :  { %v418_v7 = vadd.f32 %v417_v6, %v398_v5 }
 0x124   :  { %v438_v10 = vadd.f32 %v437_v8, %v418_v7 }
 0x126   :  { %v457_v11 = vadd.f32 %v456_v9, %v438_v10 }
 0x128   :  { %459 = vst.msk [vmem:[%s643_s5] sm:$0xff] %vm452_vm3, %v457_v11 }

</bundles_post_ra>
